<compile_context>
chip_gen: v5e
topology: v5e:2x2
jax: 0.10.0
libtpu: 0.0.40
codegen_flags: <defaults>
</compile_context>

<pallas_src>
import math

import jax
import jax.numpy as jnp
from jax.experimental import pallas as pl
from jax.experimental.pallas import tpu as pltpu


def _round_up(v, m):
    return (v + m - 1) // m * m


def _cdiv(a, b):
    return (a + b - 1) // b


def _vmem_capacity_bytes():
    try:
        return int(pltpu.get_tpu_info().vmem_capacity_bytes)
    except Exception:
        return 64 << 20          # conservative: v7x per-TensorCore VMEM


def _choose_row_tile(N, Ho, Wo_p, Cp, out_itemsize, big_vmem):
    """Output-row tile size (th).  Generation-aware VMEM budget."""
    budget = (20 << 20) if big_vmem else (5 << 20)     # single-buffered / step
    target_rows = 4096 if big_vmem else 1024           # matmul M rows / step
    per_row = (3 * (Wo_p + 1) * (2 * Cp) * 2           # 3 bf16 pair-planes
               + Wo_p * Cp * out_itemsize              # output tile
               + Wo_p * Cp * 4)                        # f32 accumulator
    th = max(1, min(target_rows // max(Wo_p, 1), budget // per_row))
    th = min(th, _round_up(Ho, 8))                     # bound per-image padding
    if th >= 8:
        th = (th // 8) * 8
    # keep >=4 grid steps so v7x's two TensorCores both get work
    while th >= 16 and _cdiv(N * Ho, th) < 4:
        th //= 2
    return max(th, 1)


def _conv3x3s2_kernel(a_ref, b_ref, c_ref, w01_ref, w2_ref, bias_ref, o_ref):
    # a/b/c_ref : (th, Wo_p+1, 2*Cp) bf16 -- paired columns of the top/mid/
    #             bottom row plane: pair j = [col 2j channels, col 2j+1 channels]
    # w01_ref   : (3, 2*Cp, Cp) bf16     -- per kh: [w[kh,0]; w[kh,1]] along K
    # w2_ref    : (3,   Cp, Cp) bf16     -- per kh:  w[kh,2]
    # bias_ref  : (1, Cp) f32
    # o_ref     : (th, Wo_p, Cp)
    th, wop, cp = o_ref.shape
    planes = (a_ref, b_ref, c_ref)

    def tap01(p):      # kw=0,1 taps: aligned, contiguous, K = 2*Cp (full MXU)
        return p[:, 0:wop, :].reshape(th * wop, 2 * cp)

    def tap2(p):       # kw=2 tap: first Cp lanes of the next pair
        return p[:, 1:wop + 1, 0:cp].reshape(th * wop, cp)

    # First matmul initializes the accumulator (no zero-fill + add pass).
    acc = jnp.dot(tap01(planes[0]), w01_ref[0],
                  preferred_element_type=jnp.float32)
    acc += jnp.dot(tap2(planes[0]), w2_ref[0],
                   preferred_element_type=jnp.float32)
    for kh in (1, 2):
        acc += jnp.dot(tap01(planes[kh]), w01_ref[kh],
                       preferred_element_type=jnp.float32)
        acc += jnp.dot(tap2(planes[kh]), w2_ref[kh],
                       preferred_element_type=jnp.float32)
    acc += bias_ref[...].astype(jnp.float32)
    o_ref[...] = acc.reshape(th, wop, cp).astype(o_ref.dtype)


def downsample_block(x_nchw, weight, bias):
    """Forward pass of DownSampleBlock.  x_nchw: (N, C, H, W)."""
    N, C, H, W = x_nchw.shape
    Cout, Cin, KH, KW = weight.shape
    assert Cout == C and Cin == C and KH == 3 and KW == 3

    Hp, Wp = H + 1, W + 1                    # after F.pad (0,1,0,1)
    Ho = (Hp - 3) // 2 + 1
    Wo = (Wp - 3) // 2 + 1
    Cp = _round_up(C, 128)                   # lane-dense / MXU-aligned channels
    Wo_p = _round_up(Wo, 8)                  # aligned in-kernel reshapes

    out_dtype = jnp.bfloat16 if x_nchw.dtype == jnp.bfloat16 else jnp.float32
    out_itemsize = jnp.dtype(out_dtype).itemsize

    vmem_cap = _vmem_capacity_bytes()
    big_vmem = vmem_cap >= (96 << 20)        # v5e/v6e: 128 MiB; v7x: 64 MiB
    th = _choose_row_tile(N, Ho, Wo_p, Cp, out_itemsize, big_vmem)
    Ho_pad = _round_up(Ho, th)
    R = N * Ho_pad

    Wtot = 2 * Wo_p + 2                      # width incl. conv + alignment pad
    Htot = 2 * Ho_pad + 1                    # height incl. conv + tile pad

    # ---- single layout pass: transpose + cast + one pad -------------------
    x = jnp.transpose(x_nchw, (0, 2, 3, 1)).astype(jnp.bfloat16)   # NHWC bf16
    xp = jnp.pad(x, ((0, 0), (0, Htot - H), (0, Wtot - W), (0, Cp - C)))

    # ---- three halo-free row planes; pairing reshape is free --------------
    def make_plane(row_start):
        p = xp[:, row_start:row_start + 2 * Ho_pad:2]   # (N, Ho_pad, Wtot, Cp)
        return p.reshape(R, Wo_p + 1, 2 * Cp)            # pure relabel
    plane_a = make_plane(0)                  # kh = 0 rows (2i)
    plane_b = make_plane(1)                  # kh = 1 rows (2i+1)
    plane_c = make_plane(2)                  # kh = 2 rows (2i+2)

    # ---- weights: (Cout,Cin,3,3) -> per-kh K-stacked matrices -------------
    w = jnp.transpose(weight, (2, 3, 1, 0))                          # kh,kw,Ci,Co
    w = jnp.pad(w, ((0, 0), (0, 0), (0, Cp - C), (0, Cp - C)))
    w01 = jnp.concatenate([w[:, 0], w[:, 1]], axis=1).astype(jnp.bfloat16)
    w2 = w[:, 2].astype(jnp.bfloat16)
    b_row = jnp.pad(bias, (0, Cp - C)).reshape(1, Cp).astype(jnp.float32)

    # ---- VMEM budget / cost hints ------------------------------------------
    step_in = 3 * th * (Wo_p + 1) * (2 * Cp) * 2
    step_out = th * Wo_p * Cp * out_itemsize
    w_bytes = int(w01.size) * 2 + int(w2.size) * 2 + int(b_row.size) * 4
    scratch = 2 * th * Wo_p * Cp * 4                     # acc + MXU temporaries
    want = 2 * (step_in + step_out) + 2 * w_bytes + scratch + (8 << 20)
    cap = (100 << 20) if big_vmem else (48 << 20)        # explicit v7x headroom
    vmem_limit = int(min(cap, max(32 << 20, want)))

    flops = 2 * R * Wo_p * 9 * Cp * Cp
    bytes_accessed = (3 * R * (Wo_p + 1) * (2 * Cp) * 2 + w_bytes
                      + R * Wo_p * Cp * out_itemsize)

    # ---- pallas call --------------------------------------------------------
    plane_spec = pl.BlockSpec((th, Wo_p + 1, 2 * Cp), lambda i: (i, 0, 0))
    out = pl.pallas_call(
        _conv3x3s2_kernel,
        out_shape=jax.ShapeDtypeStruct((R, Wo_p, Cp), out_dtype),
        grid=(R // th,),
        in_specs=[plane_spec, plane_spec, plane_spec,
                  pl.BlockSpec((3, 2 * Cp, Cp), lambda i: (0, 0, 0)),  # grid-invariant
                  pl.BlockSpec((3, Cp, Cp), lambda i: (0, 0, 0)),
                  pl.BlockSpec((1, Cp), lambda i: (0, 0))],
        out_specs=pl.BlockSpec((th, Wo_p, Cp), lambda i: (i, 0, 0)),
        compiler_params=pltpu.CompilerParams(
            dimension_semantics=("parallel",),
            vmem_limit_bytes=vmem_limit),
        cost_estimate=pl.CostEstimate(
            flops=flops, transcendentals=0, bytes_accessed=bytes_accessed),
    )(plane_a, plane_b, plane_c, w01, w2, b_row)

    out = out.reshape(N, Ho_pad, Wo_p, Cp)[:, :Ho, :Wo, :C]
    return jnp.transpose(out, (0, 3, 1, 2)).astype(x_nchw.dtype)     # back to NCHW


def init_params(key, channels):
    """Deterministic Conv2d(C, C, 3) params, matching PyTorch default init."""
    kw_key, kb_key = jax.random.split(key)
    fan_in = channels * 3 * 3
    bound = 1.0 / math.sqrt(fan_in)
    weight = jax.random.uniform(
        kw_key, (channels, channels, 3, 3), jnp.float32, -bound, bound)
    bias = jax.random.uniform(kb_key, (channels,), jnp.float32, -bound, bound)
    return weight, bias


if __name__ == "__main__":
    key = jax.random.PRNGKey(0)
    k_x, k_p = jax.random.split(key)

    N, C, H, W = 2, 4, 16, 16
    x = jax.random.normal(k_x, (N, C, H, W), jnp.float32)
    weight, bias = init_params(k_p, C)

    out = jax.block_until_ready(downsample_block(x, weight, bias))

    # Reference: XLA f32 conv with the same asymmetric padding semantics.
    x_padded = jnp.pad(x, ((0, 0), (0, 0), (0, 1), (0, 1)))
    ref = jax.lax.conv_general_dilated(
        x_padded, weight, window_strides=(2, 2), padding="VALID",
        dimension_numbers=("NCHW", "OIHW", "NCHW")) + bias.reshape(1, C, 1, 1)

    assert out.shape == (N, C, 8, 8), out.shape
    # bf16 matmul operands with f32 accumulation -> loosened tolerance
    assert jnp.allclose(out, ref, atol=5e-2, rtol=5e-2), "mismatch vs reference conv"
    print("KERNEL_OK")
</pallas_src>

<mosaic_0001>
module attributes {stable_mosaic.version = 11 : i64} {
  func.func @_conv3x3s2_kernel(%arg0: i32, %arg1: memref<8x9x256xbf16, #tpu.memory_space<vmem>>, %arg2: memref<8x9x256xbf16, #tpu.memory_space<vmem>>, %arg3: memref<8x9x256xbf16, #tpu.memory_space<vmem>>, %arg4: memref<3x256x128xbf16, #tpu.memory_space<vmem>>, %arg5: memref<3x128x128xbf16, #tpu.memory_space<vmem>>, %arg6: memref<1x128xf32, #tpu.memory_space<vmem>>, %arg7: memref<8x8x128xf32, #tpu.memory_space<vmem>>) attributes {dimension_semantics = [#tpu.dimension_semantics<parallel>], iteration_bounds = array<i64: 2>, scalar_prefetch = 0 : i64, scratch_operands = 0 : i64, tpu.core_type = #tpu.core_type<tc>, window_params = [{transform_indices = @transform_0, window_bounds = array<i64: 8, 9, 256>}, {transform_indices = @transform_1, window_bounds = array<i64: 8, 9, 256>}, {transform_indices = @transform_2, window_bounds = array<i64: 8, 9, 256>}, {pipeline_mode = #tpu.pipeline_mode<synchronous>, transform_indices = @transform_3, window_bounds = array<i64: 3, 256, 128>}, {pipeline_mode = #tpu.pipeline_mode<synchronous>, transform_indices = @transform_4, window_bounds = array<i64: 3, 128, 128>}, {pipeline_mode = #tpu.pipeline_mode<synchronous>, transform_indices = @transform_5, window_bounds = array<i64: 1, 128>}, {transform_indices = @transform_6, window_bounds = array<i64: 8, 8, 128>}]} {
    %c0 = arith.constant 0 : index
    %c0_0 = arith.constant 0 : index
    %c0_1 = arith.constant 0 : index
    %0 = vector.load %arg1[%c0, %c0_0, %c0_1] : memref<8x9x256xbf16, #tpu.memory_space<vmem>>, vector<8x8x256xbf16>
    %1 = vector.shape_cast %0 : vector<8x8x256xbf16> to vector<64x256xbf16>
    %c0_2 = arith.constant 0 : index
    %c0_3 = arith.constant 0 : index
    %c0_4 = arith.constant 0 : index
    %2 = vector.load %arg4[%c0_2, %c0_3, %c0_4] : memref<3x256x128xbf16, #tpu.memory_space<vmem>>, vector<1x256x128xbf16>
    %3 = vector.shape_cast %2 : vector<1x256x128xbf16> to vector<256x128xbf16>
    %cst = arith.constant dense<0.000000e+00> : vector<64x128xf32>
    %4 = tpu.matmul %1, %3, %cst {dimension_numbers = #tpu.dot_dimension_numbers<[1], [0], [0], [1], [0, 0, 1, 1], [], []>} : vector<64x256xbf16>, vector<256x128xbf16>, vector<64x128xf32> -> vector<64x128xf32>
    %c0_5 = arith.constant 0 : index
    %c1 = arith.constant 1 : index
    %c0_6 = arith.constant 0 : index
    %5 = vector.load %arg1[%c0_5, %c1, %c0_6] : memref<8x9x256xbf16, #tpu.memory_space<vmem>>, vector<8x8x128xbf16>
    %6 = vector.shape_cast %5 : vector<8x8x128xbf16> to vector<64x128xbf16>
    %c0_7 = arith.constant 0 : index
    %c0_8 = arith.constant 0 : index
    %c0_9 = arith.constant 0 : index
    %7 = vector.load %arg5[%c0_7, %c0_8, %c0_9] : memref<3x128x128xbf16, #tpu.memory_space<vmem>>, vector<1x128x128xbf16>
    %8 = vector.shape_cast %7 : vector<1x128x128xbf16> to vector<128x128xbf16>
    %cst_10 = arith.constant dense<0.000000e+00> : vector<64x128xf32>
    %9 = tpu.matmul %6, %8, %cst_10 {dimension_numbers = #tpu.dot_dimension_numbers<[1], [0], [0], [1], [0, 0, 1, 1], [], []>} : vector<64x128xbf16>, vector<128x128xbf16>, vector<64x128xf32> -> vector<64x128xf32>
    %10 = arith.addf %4, %9 : vector<64x128xf32>
    %c0_11 = arith.constant 0 : index
    %c0_12 = arith.constant 0 : index
    %c0_13 = arith.constant 0 : index
    %11 = vector.load %arg2[%c0_11, %c0_12, %c0_13] : memref<8x9x256xbf16, #tpu.memory_space<vmem>>, vector<8x8x256xbf16>
    %12 = vector.shape_cast %11 : vector<8x8x256xbf16> to vector<64x256xbf16>
    %c1_14 = arith.constant 1 : index
    %c0_15 = arith.constant 0 : index
    %c0_16 = arith.constant 0 : index
    %13 = vector.load %arg4[%c1_14, %c0_15, %c0_16] : memref<3x256x128xbf16, #tpu.memory_space<vmem>>, vector<1x256x128xbf16>
    %14 = vector.shape_cast %13 : vector<1x256x128xbf16> to vector<256x128xbf16>
    %cst_17 = arith.constant dense<0.000000e+00> : vector<64x128xf32>
    %15 = tpu.matmul %12, %14, %cst_17 {dimension_numbers = #tpu.dot_dimension_numbers<[1], [0], [0], [1], [0, 0, 1, 1], [], []>} : vector<64x256xbf16>, vector<256x128xbf16>, vector<64x128xf32> -> vector<64x128xf32>
    %16 = arith.addf %10, %15 : vector<64x128xf32>
    %c0_18 = arith.constant 0 : index
    %c1_19 = arith.constant 1 : index
    %c0_20 = arith.constant 0 : index
    %17 = vector.load %arg2[%c0_18, %c1_19, %c0_20] : memref<8x9x256xbf16, #tpu.memory_space<vmem>>, vector<8x8x128xbf16>
    %18 = vector.shape_cast %17 : vector<8x8x128xbf16> to vector<64x128xbf16>
    %c1_21 = arith.constant 1 : index
    %c0_22 = arith.constant 0 : index
    %c0_23 = arith.constant 0 : index
    %19 = vector.load %arg5[%c1_21, %c0_22, %c0_23] : memref<3x128x128xbf16, #tpu.memory_space<vmem>>, vector<1x128x128xbf16>
    %20 = vector.shape_cast %19 : vector<1x128x128xbf16> to vector<128x128xbf16>
    %cst_24 = arith.constant dense<0.000000e+00> : vector<64x128xf32>
    %21 = tpu.matmul %18, %20, %cst_24 {dimension_numbers = #tpu.dot_dimension_numbers<[1], [0], [0], [1], [0, 0, 1, 1], [], []>} : vector<64x128xbf16>, vector<128x128xbf16>, vector<64x128xf32> -> vector<64x128xf32>
    %22 = arith.addf %16, %21 : vector<64x128xf32>
    %c0_25 = arith.constant 0 : index
    %c0_26 = arith.constant 0 : index
    %c0_27 = arith.constant 0 : index
    %23 = vector.load %arg3[%c0_25, %c0_26, %c0_27] : memref<8x9x256xbf16, #tpu.memory_space<vmem>>, vector<8x8x256xbf16>
    %24 = vector.shape_cast %23 : vector<8x8x256xbf16> to vector<64x256xbf16>
    %c2 = arith.constant 2 : index
    %c0_28 = arith.constant 0 : index
    %c0_29 = arith.constant 0 : index
    %25 = vector.load %arg4[%c2, %c0_28, %c0_29] : memref<3x256x128xbf16, #tpu.memory_space<vmem>>, vector<1x256x128xbf16>
    %26 = vector.shape_cast %25 : vector<1x256x128xbf16> to vector<256x128xbf16>
    %cst_30 = arith.constant dense<0.000000e+00> : vector<64x128xf32>
    %27 = tpu.matmul %24, %26, %cst_30 {dimension_numbers = #tpu.dot_dimension_numbers<[1], [0], [0], [1], [0, 0, 1, 1], [], []>} : vector<64x256xbf16>, vector<256x128xbf16>, vector<64x128xf32> -> vector<64x128xf32>
    %28 = arith.addf %22, %27 : vector<64x128xf32>
    %c0_31 = arith.constant 0 : index
    %c1_32 = arith.constant 1 : index
    %c0_33 = arith.constant 0 : index
    %29 = vector.load %arg3[%c0_31, %c1_32, %c0_33] : memref<8x9x256xbf16, #tpu.memory_space<vmem>>, vector<8x8x128xbf16>
    %30 = vector.shape_cast %29 : vector<8x8x128xbf16> to vector<64x128xbf16>
    %c2_34 = arith.constant 2 : index
    %c0_35 = arith.constant 0 : index
    %c0_36 = arith.constant 0 : index
    %31 = vector.load %arg5[%c2_34, %c0_35, %c0_36] : memref<3x128x128xbf16, #tpu.memory_space<vmem>>, vector<1x128x128xbf16>
    %32 = vector.shape_cast %31 : vector<1x128x128xbf16> to vector<128x128xbf16>
    %cst_37 = arith.constant dense<0.000000e+00> : vector<64x128xf32>
    %33 = tpu.matmul %30, %32, %cst_37 {dimension_numbers = #tpu.dot_dimension_numbers<[1], [0], [0], [1], [0, 0, 1, 1], [], []>} : vector<64x128xbf16>, vector<128x128xbf16>, vector<64x128xf32> -> vector<64x128xf32>
    %34 = arith.addf %28, %33 : vector<64x128xf32>
    %c0_38 = arith.constant 0 : index
    %c0_39 = arith.constant 0 : index
    %35 = vector.load %arg6[%c0_38, %c0_39] : memref<1x128xf32, #tpu.memory_space<vmem>>, vector<1x128xf32>
    %36 = vector.broadcast %35 : vector<1x128xf32> to vector<64x128xf32>
    %37 = arith.addf %34, %36 : vector<64x128xf32>
    %38 = vector.shape_cast %37 : vector<64x128xf32> to vector<8x8x128xf32>
    %c0_40 = arith.constant 0 : index
    %c0_41 = arith.constant 0 : index
    %c0_42 = arith.constant 0 : index
    %39 = vector.load %arg7[%c0_40, %c0_41, %c0_42] : memref<8x8x128xf32, #tpu.memory_space<vmem>>, vector<8x8x128xf32>
    tpu.vector_store %arg7[%c0_40, %c0_41, %c0_42], %38 {strides = array<i32>} : memref<8x8x128xf32, #tpu.memory_space<vmem>>, vector<8x8x128xf32>,
    return
  }
  func.func @transform_0(%arg0: i32) -> (i32, i32, i32) {
    %c0_i32 = arith.constant 0 : i32
    %c0_i32_0 = arith.constant 0 : i32
    %c0_i32_1 = arith.constant 0 : i32
    return %arg0, %c0_i32, %c0_i32_0 : i32, i32, i32
  }
  func.func @transform_1(%arg0: i32) -> (i32, i32, i32) {
    %c0_i32 = arith.constant 0 : i32
    %c0_i32_0 = arith.constant 0 : i32
    %c0_i32_1 = arith.constant 0 : i32
    return %arg0, %c0_i32, %c0_i32_0 : i32, i32, i32
  }
  func.func @transform_2(%arg0: i32) -> (i32, i32, i32) {
    %c0_i32 = arith.constant 0 : i32
    %c0_i32_0 = arith.constant 0 : i32
    %c0_i32_1 = arith.constant 0 : i32
    return %arg0, %c0_i32, %c0_i32_0 : i32, i32, i32
  }
  func.func @transform_3(%arg0: i32) -> (i32, i32, i32) {
    %c0_i32 = arith.constant 0 : i32
    %c0_i32_0 = arith.constant 0 : i32
    %c0_i32_1 = arith.constant 0 : i32
    %c0_i32_2 = arith.constant 0 : i32
    return %c0_i32, %c0_i32_0, %c0_i32_1 : i32, i32, i32
  }
  func.func @transform_4(%arg0: i32) -> (i32, i32, i32) {
    %c0_i32 = arith.constant 0 : i32
    %c0_i32_0 = arith.constant 0 : i32
    %c0_i32_1 = arith.constant 0 : i32
    %c0_i32_2 = arith.constant 0 : i32
    return %c0_i32, %c0_i32_0, %c0_i32_1 : i32, i32, i32
  }
  func.func @transform_5(%arg0: i32) -> (i32, i32) {
    %c0_i32 = arith.constant 0 : i32
    %c0_i32_0 = arith.constant 0 : i32
    %c0_i32_1 = arith.constant 0 : i32
    return %c0_i32, %c0_i32_0 : i32, i32
  }
  func.func @transform_6(%arg0: i32) -> (i32, i32, i32) {
    %c0_i32 = arith.constant 0 : i32
    %c0_i32_0 = arith.constant 0 : i32
    %c0_i32_1 = arith.constant 0 : i32
    return %arg0, %c0_i32, %c0_i32_0 : i32, i32, i32
  }
}

</mosaic_0001>

<bundles_post_ra>
// kernel: tpu_custom_call.1
= control target key start
LH: loop header
LB: loop body
LE: loop exit
PB: predicated region body
PF: predicated region fallthrough
CT: control target
= control target key end

     0   :  { %11 = vsyncpa [#allocation3], 0  ;;  %s3183_s0 = inlined_call_operand.vmem [shape: bf16[16,9,256], index: 0, kind: input, shape index: {}]   ;;  %s3184_s1 = inlined_call_operand.vmem [shape: bf16[16,9,256], index: 1, kind: input, shape index: {}]   ;;  %s3185_s2 = inlined_call_operand.vmem [shape: bf16[16,9,256], index: 2, kind: input, shape index: {}]   ;;  %s3186_s3 = inlined_call_operand.vmem [shape: bf16[3,256,128], index: 3, kind: input, shape index: {}]   ;;  %s3187_s4 = inlined_call_operand.vmem [shape: bf16[3,128,128], index: 4, kind: input, shape index: {}]   ;;  %s3188_s5 = inlined_call_operand.vmem [shape: f32[1,128], index: 5, kind: input, shape index: {}]   ;;  %s3189_s6 = inlined_call_operand.hbm [shape: f32[16,8,128], index: 6, kind: output, shape index: {}]  }
   0x1   :  { %13 = vsyncpa [#allocation3 + $0x1], 0  ;;  %s2638_s21 = smov 0   ;;  %s2640_s22 = smov 0  }
   0x2   :  { %s2642_s23 = smov 0   ;;  %s2644_s24 = smov 0  }
   0x3 LB: > { %s2659_s25 = sadd.s32 4294967295, %s2599_s24   ;;  %s1880_s26 = sadd.s32 4294967294, %s2599_s24   ;;  %s2599_s24 = sphi %s2644_s24, %s3197_s24   ;;  %s2595_s23 = sphi %s2642_s23, %s3196_s23   ;;  %s2591_s22 = sphi %s2640_s22, %s3195_s22   ;;  %s2587_s21 = sphi %s2638_s21, %s3194_s21  }
   0x4   : > { %s2663_s27 = sadd.s32 1, %s2599_s24   ;;  %s167_s28 = sadd.s32 1, %s2595_s23 }
   0x5   : > { %s164_s29 = ssub.s32 %s2599_s24, %s2663_s27  ;;  %p177_p0 = scmp.ne.s32.totalorder %s2595_s23, %s2591_s22 }
   0x6   : > { %p165_p1 = scmp.eq.s32.totalorder %s164_s29, 0  ;;  %p178_p2 = scmp.eq.s32.totalorder %s2659_s25, 1 }
   0x7   : > { %p183_p3 = scmp.ne.s32.totalorder %s2591_s22, %s2587_s21  ;;  %p184_p4 = scmp.eq.s32.totalorder %s1880_s26, 1 }
   0x8   : > { %s2674_s30 = scalar_select %p165_p1, %s2595_s23, %s167_s28  }
   0x9   : > { %p2676_p5 = por %p178_p2, %p177_p0  ;;  %p2680_p6 = por %p184_p4, %p183_p3 }
   0xa   : > { %p1883_p7 = scmp.ge.s32.totalorder %s2599_s24, 1  ;;  %p241_p8 = scmp.lt.s32.totalorder %s2599_s24, 3 }
   0xc   : > { %p242_p9 = pnand %p1883_p7, %p241_p8 }
   0xd   : > { %s1885_s13 = sshll.u32 (!%p242_p9), %s2659_s25, 3  ;;  %s2478_s16 = sshll.u32 (!%p242_p9), %s2659_s25, 6 }
   0xe   : > { %245 = sbr.rel (%p242_p9) target bundleno = 341 (0x155), region = 44  ;;  %p285_p10 = scmp.lt.s32.totalorder (!%p242_p9), %s1885_s13, 15 }
   0xf   : > { %s1790_s19 = scalar_lea.hbm (!%p242_p9), %s3189_s6, %s2478_s16 }
  0x10   : > { %s1793_s26 = sshll.u32 (!%p242_p9), %s1790_s19, 4  ;;  %s1794_s26 = int_to_ptr.hbm [resolvable:$true] %s1793_s26 }
  0x11   : > { %s2551_s29 = sshra.s32 (!%p242_p9), %s1794_s26, 4  ;;  %s2552_s29 = int_to_ptr.hbm [resolvable:$true] %s2551_s29 }
  0x12   : > { %p2558_p0 = scmp.lt.s32.totalorder (!%p242_p9), %s2552_s29, %s3189_s6 }
  0x13   : > { %v2413_v0 = vld [vmem:[%s3187_s4 + $0x38] sm:$0xff]  ;;  %v2412_v3 = vld [vmem:[%s3187_s4 + $0x30] sm:$0xff]  ;;  %s3199_s13 = smov (!%p285_p10, %s1885_s13), 15  ;;  %v2411_v6 = vld [vmem:[%s3187_s4 + $0x28] sm:$0xff]  ;;  %vm362_vm0 = vsmask.f32 3328 }
  0x14   : > { %v2405_v1 = vld [vmem:[%s3186_s3 + $0x78] sm:$0xff]  ;;  %557 = vmatpush.bf16.msra.mxu0 %v2413_v0  ;;  %2479 = vmatpush.bf16.msra.mxu1 %v2413_v0  ;;  %v2404_v4 = vld [vmem:[%s3186_s3 + $0x70] sm:$0xff]  ;;  %s2705_s28 = sshll.u32 %s3199_s13, 4  ;;  %v2403_v7 = vld [vmem:[%s3186_s3 + $0x68] sm:$0xff]  ;;  %vm363_vm1 = vsmask.f32 7440 }
  0x15   : > { %v2429_v2 = vld [vmem:[%s3186_s3 + $0xb8] sm:$0xff]  ;;  %751 = vmatpush.bf16.msra.mxu2 %v2405_v1  ;;  %v2428_v5 = vld [vmem:[%s3186_s3 + $0xb0] sm:$0xff]  ;;  %s2714_s12 = scalar_lea.vmem %s3183_s0, %s2705_s28  ;;  %v2427_v8 = vld [vmem:[%s3186_s3 + $0xa8] sm:$0xff]  ;;  %s2797_s9 = scalar_lea.vmem %s3184_s1, %s2705_s28 }
  0x16   : > { %957 = vmatpush.bf16.msra.mxu3 %v2429_v2  ;;  %v346_v9 = vld [vmem:[%s2714_s12] sm:$0xf]  ;;  %v347_v11 = vld [vmem:[%s2714_s12 + $0x8] sm:$0x1]  ;;  %v348_v12 = vld [vmem:[%s2714_s12 + $0x10] sm:$0xf]  ;;  %s2980_s10 = scalar_lea.vmem %s3185_s2, %s2705_s28 }
  0x17   : > { %v2410_v10 = vld [vmem:[%s3187_s4 + $0x20] sm:$0xff]  ;;  %v366_v13 = vshrl.u32 %v346_v9, 16  ;;  %v369_v14 = vshll.u32 %v346_v9, 16  ;;  %v349_v16 = vld [vmem:[%s2714_s12 + $0x18] sm:$0x1]  ;;  %v380_v17 = vshrl.u32 %v348_v12, 16  ;;  %vm2749_vm2 = vmor %vm362_vm0, %vm363_vm1 }
  0x18   : > { %558 = vmatpush.bf16.msra.mxu0 %v2412_v3  ;;  %2480 = vmatpush.bf16.msra.mxu1 %v2412_v3  ;;  %v2402_v15 = vld [vmem:[%s3186_s3 + $0x60] sm:$0xff]  ;;  %v383_v18 = vshll.u32 %v348_v12, 16  ;;  %v355_v22 = vld [vmem:[%s2714_s12 + $0x48] sm:$0x1]  ;;  %v356_v23 = vld [vmem:[%s2714_s12 + $0x50] sm:$0xf] }
  0x19   : > { %752 = vmatpush.bf16.msra.mxu2 %v2404_v4  ;;  %v354_v19 = vld [vmem:[%s2714_s12 + $0x40] sm:$0xf]  ;;  %v368_v20 = vrot.slane %v366_v13, 4  ;;  %v371_v21 = vrot.slane %v369_v14, 5  ;;  %v375_v25 = vshll.u32 %v347_v11, 16  ;;  %v382_v26 = vrot.slane %v380_v17, 4 }
  0x1a   : > { %958 = vmatpush.bf16.msra.mxu3 %v2428_v5  ;;  %v2426_v24 = vld [vmem:[%s3186_s3 + $0xa0] sm:$0xff]  ;;  %v385_v27 = vrot.slane %v383_v18, 5  ;;  %v357_v28 = vld [vmem:[%s2714_s12 + $0x58] sm:$0x1]  ;;  %v389_v30 = vshll.u32 %v349_v16, 16  ;;  %v422_v31 = vshrl.u32 %v354_v19, 16 }
  0x1b   : > { %v372_v29 = vor.u32 %v371_v21, %v368_v20  ;;  %v425_v32 = vshll.u32 %v354_v19, 16  ;;  %v431_v34 = vshll.u32 %v355_v22, 16  ;;  %v436_v35 = vshrl.u32 %v356_v23, 16  ;;  %v2409_v37 = vld [vmem:[%s3187_s4 + $0x18] sm:$0xff]  ;;  %v2408_v53 = vld [vmem:[%s3187_s4 + $0x10] sm:$0xff]  ;;  %v2407_v4 = vld [vmem:[%s3187_s4 + $0x8] sm:$0xff] }
  0x1c   : > { %559 = vmatpush.bf16.msra.mxu0 %v2411_v6  ;;  %2481 = vmatpush.bf16.msra.mxu1 %v2411_v6  ;;  %v386_v33 = vor.u32 %v385_v27, %v382_v26  ;;  %v439_v36 = vshll.u32 %v356_v23, 16  ;;  %v424_v38 = vrot.slane %v422_v31, 4  ;;  %v445_v40 = vshll.u32 %v357_v28, 16  ;;  %v2401_v41 = vld [vmem:[%s3186_s3 + $0x58] sm:$0xff]  ;;  %v350_v56 = vld [vmem:[%s2714_s12 + $0x20] sm:$0xf] }
  0x1d   : > { %753 = vmatpush.bf16.msra.mxu2 %v2403_v7  ;;  %v427_v39 = vrot.slane %v425_v32, 5  ;;  %v2425_v42 = vld [vmem:[%s3186_s3 + $0x98] sm:$0xff]  ;;  %v438_v43 = vrot.slane %v436_v35, 4  ;;  %v373_v45 = vrot.slane %v372_v29, 4  ;;  %v377_v46 = vrot.slane %v375_v25, 5  ;;  %v2400_v57 = vld [vmem:[%s3186_s3 + $0x50] sm:$0xff] }
  0x1e   : > { %959 = vmatpush.bf16.msra.mxu3 %v2427_v8  ;;  %v441_v44 = vrot.slane %v439_v36, 5  ;;  %v387_v49 = vrot.slane %v386_v33, 4  ;;  %v391_v50 = vrot.slane %v389_v30, 5  ;;  %v433_v51 = vrot.slane %v431_v34, 5  ;;  %v2424_v58 = vld [vmem:[%s3186_s3 + $0x90] sm:$0xff]  ;;  %v2399_v8 = vld [vmem:[%s3186_s3 + $0x48] sm:$0xff] }
  0x1f   : > { %v428_v47 = vor.u32 %v427_v39, %v424_v38  ;;  %v447_v55 = vrot.slane %v445_v40, 5  ;;  %v352_v60 = vld [vmem:[%s2714_s12 + $0x30] sm:$0xf]  ;;  %v378_v61 = vsel %vm2749_vm2, %v373_v45, %v377_v46  ;;  %v394_v62 = vshrl.u32 %v350_v56, 16  ;;  %v358_v63 = vld [vmem:[%s2714_s12 + $0x60] sm:$0xf] }
  0x20   : > { %560 = vmatpush.bf16.msra.mxu0 %v2410_v10  ;;  %2482 = vmatpush.bf16.msra.mxu1 %v2410_v10  ;;  %v442_v52 = vor.u32 %v441_v44, %v438_v43  ;;  %v392_v0 = vsel %vm2749_vm2, %v387_v49, %v391_v50  ;;  %v397_v2 = vshll.u32 %v350_v56, 16  ;;  %v408_v3 = vshrl.u32 %v352_v60, 16  ;;  %v360_v7 = vld [vmem:[%s2714_s12 + $0x70] sm:$0xf]  ;;  %v2423_v9 = vld [vmem:[%s3186_s3 + $0x88] sm:$0xff]  ;;  %v2406_v12 = vld [vmem:[%s3187_s4] sm:$0xff] }
  0x21   : > { %754 = vmatpush.bf16.msra.mxu2 %v2402_v15  ;;  %v429_v54 = vrot.slane %v428_v47, 4  ;;  %v411_v6 = vshll.u32 %v352_v60, 16  ;;  %v450_v10 = vshrl.u32 %v358_v63, 16  ;;  %v453_v11 = vshll.u32 %v358_v63, 16  ;;  %v351_v16 = vld [vmem:[%s2714_s12 + $0x28] sm:$0x1] }
  0x22   : > { %960 = vmatpush.bf16.msra.mxu3 %v2426_v24  ;;  %v443_v59 = vrot.slane %v442_v52, 4  ;;  %v493_v13 = vunpack.c.l.b16 %v378_v61  ;;  %v494_v14 = vunpack.c.l.b16 %v392_v0  ;;  %v396_v17 = vrot.slane %v394_v62, 4  ;;  %v2397_v19 = vld [vmem:[%s3186_s3 + $0x38] sm:$0xff]  ;;  %v2398_v25 = vld [vmem:[%s3186_s3 + $0x40] sm:$0xff]  ;;  %v359_v27 = vld [vmem:[%s2714_s12 + $0x68] sm:$0x1] }
  0x23   : > { %v434_v1 = vsel %vm2749_vm2, %v429_v54, %v433_v51  ;;  %v2437_v20 = vld [vmem:[%s3186_s3 + $0xf8] sm:$0xff]  ;;  %v399_v22 = vrot.slane %v397_v2, 5  ;;  %v410_v23 = vrot.slane %v408_v3, 4  ;;  %v464_v24 = vshrl.u32 %v360_v7, 16  ;;  %v2422_v31 = vld [vmem:[%s3186_s3 + $0x80] sm:$0xff]  ;;  %v2396_v52 = vld [vmem:[%s3186_s3 + $0x30] sm:$0xff] }
  0x24   : > { %561 = vmatpush.bf16.msra.mxu0 %v2409_v37  ;;  %2483 = vmatpush.bf16.msra.mxu1 %v2409_v37  ;;  %v448_v5 = vsel %vm2749_vm2, %v443_v59, %v447_v55  ;;  %v497_v15 = vunpack.c.l.b16 %v434_v1  ;;  %v353_v21 = vld [vmem:[%s2714_s12 + $0x38] sm:$0x1]  ;;  %v413_v26 = vrot.slane %v411_v6, 5  ;;  %v452_v28 = vrot.slane %v450_v10, 4  ;;  %v2382_v32 = vld [vmem:[%s2714_s12 + $0x4] sm:$0xf] }
  0x25   : > { %755 = vmatpush.bf16.msra.mxu2 %v2401_v41  ;;  %v498_v18 = vunpack.c.l.b16 %v448_v5  ;;  %v455_v29 = vrot.slane %v453_v11, 5  ;;  %v467_v30 = vshll.u32 %v360_v7, 16  ;;  %v361_v33 = vld [vmem:[%s2714_s12 + $0x78] sm:$0x1]  ;;  %v466_v34 = vrot.slane %v464_v24, 4  ;;  %v2460_v0 = vld [vmem:[%s3186_s3 + $0x130] sm:$0xff] }
  0x26   : > { %961 = vmatpush.bf16.msra.mxu3 %v2425_v42  ;;  %v501_v35 = vpack.c.b16 %v494_v14, %v493_v13  ;;  %v1930_v36 = vld [vmem:[%s2714_s12 + $0x10] sm:$0xf0]  ;;  %v2056_v37 = vld [vmem:[%s2797_s9] sm:$0xf]  ;;  %v403_v38 = vshll.u32 %v351_v16, 16  ;;  %v400_v42 = vor.u32 %v399_v22, %v396_v17  ;;  %v417_v43 = vshll.u32 %v353_v21, 16 }
  0x27   : > { %v469_v39 = vrot.slane %v467_v30, 5  ;;  %v503_v40 = vpack.c.b16 %v498_v18, %v497_v15  ;;  %v2415_v41 = vld [vmem:[%s2797_s9 + $0xc] sm:$0xf0]  ;;  %v459_v44 = vshll.u32 %v359_v27, 16  ;;  %v2461_v45 = vld [vmem:[%s3186_s3 + $0x138] sm:$0xff]  ;;  %v414_v46 = vor.u32 %v413_v26, %v410_v23  ;;  %v2395_v2 = vld [vmem:[%s3186_s3 + $0x28] sm:$0xff] }
  0x28   : > { %562 = vmatpush.bf16.msra.mxu0 %v2408_v53  ;;  %2484 = vmatpush.bf16.msra.mxu1 %v2408_v53  ;;  %v456_v47 = vor.u32 %v455_v29, %v452_v28  ;;  %v473_v50 = vshll.u32 %v361_v33, 16  ;;  %v2469_v51 = vld [vmem:[%s3186_s3 + $0x178] sm:$0xff]  ;;  %v2436_v53 = vld [vmem:[%s3186_s3 + $0xf0] sm:$0xff]  ;;  %v1933_v54 = vor.u32 %v2382_v32, %v1930_v36  ;;  %v2057_v55 = vor.u32 %v2415_v41, %v2056_v37  ;;  %v2435_v3 = vld [vmem:[%s3186_s3 + $0xe8] sm:$0xff] }
  0x29   : > { %756 = vmatpush.bf16.msra.mxu2 %v2400_v57  ;;  %v470_v49 = vor.u32 %v469_v39, %v466_v34  ;;  %v401_v56 = vrot.slane %v400_v42, 4  ;;  %v405_v57 = vrot.slane %v403_v38, 5  ;;  %v461_v59 = vrot.slane %v459_v44, 5  ;;  %v2468_v1 = vld [vmem:[%s3186_s3 + $0x170] sm:$0xff]  ;;  %v2394_v10 = vld [vmem:[%s3186_s3 + $0x20] sm:$0xff]  ;;  %v2393_v17 = vld [vmem:[%s3186_s3 + $0x18] sm:$0xff] }
  0x2a   : > { %962 = vmatpush.bf16.msra.mxu3 %v2424_v58  ;;  %v419_v58 = vrot.slane %v417_v43, 5  ;;  %v415_v60 = vrot.slane %v414_v46, 4  ;;  %v457_v61 = vrot.slane %v456_v47, 4  ;;  %v475_v63 = vrot.slane %v473_v50, 5  ;;  %v2434_v11 = vld [vmem:[%s3186_s3 + $0xe0] sm:$0xff]  ;;  %v2433_v18 = vld [vmem:[%s3186_s3 + $0xd8] sm:$0xff] }
  0x2b   : > { %v471_v62 = vrot.slane %v470_v49, 4  ;;  %v2458_v16 = vld [vmem:[%s3186_s3 + $0x120] sm:$0xff]  ;;  %v1938_v22 = vld [vmem:[%s2714_s12 + $0x30] sm:$0xf0]  ;;  %v2417_v24 = vld [vmem:[%s2797_s9 + $0x2c] sm:$0xf0] }
  0x2c   : > { %563 = vmatpush.bf16.msra.mxu0 %v2407_v4  ;;  %2485 = vmatpush.bf16.msra.mxu1 %v2407_v4  ;;  %v406_v4 = vsel %vm2749_vm2, %v401_v56, %v405_v57  ;;  %v420_v5 = vsel %vm2749_vm2, %v415_v60, %v419_v58  ;;  %v462_v6 = vsel %vm2749_vm2, %v457_v61, %v461_v59  ;;  %v2064_v23 = vld [vmem:[%s2797_s9 + $0x20] sm:$0xf]  ;;  %v2392_v26 = vld [vmem:[%s3186_s3 + $0x10] sm:$0xff]  ;;  %v2431_v32 = vld [vmem:[%s3186_s3 + $0xc8] sm:$0xff] }
  0x2d   : > { %757 = vmatpush.bf16.msra.mxu2 %v2399_v8  ;;  %v476_v7 = vsel %vm2749_vm2, %v471_v62, %v475_v63  ;;  %v2459_v8 = vld [vmem:[%s3186_s3 + $0x128] sm:$0xff]  ;;  %v496_v13 = vunpack.c.l.b16 %v420_v5  ;;  %v499_v14 = vunpack.c.l.b16 %v462_v6  ;;  %v2432_v27 = vld [vmem:[%s3186_s3 + $0xd0] sm:$0xff]  ;;  %v2065_v29 = vor.u32 %v2417_v24, %v2064_v23  ;;  %v2466_v30 = vld [vmem:[%s3186_s3 + $0x160] sm:$0xff] }
  0x2e   : > { %963 = vmatpush.bf16.msra.mxu3 %v2423_v9  ;;  %v2467_v9 = vld [vmem:[%s3186_s3 + $0x168] sm:$0xff]  ;;  %v500_v15 = vunpack.c.l.b16 %v476_v7  ;;  %v2456_v33 = vld [vmem:[%s3186_s3 + $0x110] sm:$0xff]  ;;  %v2465_v34 = vld [vmem:[%s3186_s3 + $0x158] sm:$0xff] }
  0x2f   : > { %v2390_v36 = vld [vmem:[%s3186_s3] sm:$0xff]  ;;  %v2445_v38 = vld [vmem:[%s3187_s4 + $0x78] sm:$0xff]  ;;  %v2464_v41 = vld [vmem:[%s3186_s3 + $0x150] sm:$0xff] }
  0x30   : > { %564 = vmatpush.bf16.msra.mxu0 %v2406_v12  ;;  %2486 = vmatpush.bf16.msra.mxu1 %v2406_v12  ;;  %v495_v12 = vunpack.c.l.b16 %v406_v4  ;;  %v504_v21 = vpack.c.b16 %v500_v15, %v499_v14  ;;  %v2430_v37 = vld [vmem:[%s3186_s3 + $0xc0] sm:$0xff]  ;;  %v2477_v39 = vld [vmem:[%s3187_s4 + $0xb8] sm:$0xff]  ;;  %v2383_v42 = vld [vmem:[%s2714_s12 + $0xc] sm:$0xf0] }
  0x31   : > { %758 = vmatpush.bf16.msra.mxu2 %v2398_v25  ;;  %v2457_v25 = vld [vmem:[%s3186_s3 + $0x118] sm:$0xff]  ;;  %v2414_v43 = vld [vmem:[%s2797_s9 + $0x4] sm:$0xf]  ;;  %v2058_v44 = vld [vmem:[%s2797_s9 + $0x10] sm:$0xf0] }
  0x32   : > { %964 = vmatpush.bf16.msra.mxu3 %v2422_v31  ;;  %v2391_v31 = vld [vmem:[%s3186_s3 + $0x8] sm:$0xff]  ;;  %v2444_v46 = vld [vmem:[%s3187_s4 + $0x70] sm:$0xff]  ;;  %v2061_v50 = vor.u32 %v2414_v43, %v2058_v44  ;;  %v2454_v58 = vld [vmem:[%s3186_s3 + $0x100] sm:$0xff] }
  0x33   : > { %565 = vmatmul.bf16.vlgmr.msra.gmra.mxu0 %v501_v35  ;;  %575 = vmatmul.bf16.vlgmr.msra.gmra.mxu1 %v503_v40  ;;  %v2455_v35 = vld [vmem:[%s3186_s3 + $0x108] sm:$0xff]  ;;  %v1928_v40 = vld [vmem:[%s2714_s12] sm:$0xf]  ;;  %v2476_v47 = vld [vmem:[%s3187_s4 + $0xb0] sm:$0xff] }
  0x34   : > { %722 = vmatpush.bf16.msrb.mxu1 %v2397_v19  ;;  %986 = vmatpush.bf16.msrb.mxu0 %v2437_v20  ;;  %v2384_v19 = vld [vmem:[%s2714_s12 + $0x24] sm:$0xf]  ;;  %v502_v20 = vpack.c.b16 %v496_v13, %v495_v12  ;;  %v1929_v49 = vor.u32 %v2383_v42, %v1928_v40  ;;  %v2443_v57 = vld [vmem:[%s3187_s4 + $0x68] sm:$0xff]  ;;  %v1936_v63 = vld [vmem:[%s2714_s12 + $0x20] sm:$0xf] }
  0x35   : > { %1446 = vmatpush.bf16.msrb.mxu2 %v2461_v45  ;;  %965 = vmatmul.bf16.vlgmr.msra.gmra.mxu3 %v2057_v55  ;;  %v1941_v28 = vor.u32 %v2384_v19, %v1938_v22  ;;  %v2386_v45 = vld [vmem:[%s2714_s12 + $0x44] sm:$0xf]  ;;  %v2475_v60 = vld [vmem:[%s3187_s4 + $0xa8] sm:$0xff]  ;;  %v1954_v7 = vld [vmem:[%s2714_s12 + $0x70] sm:$0xf0] }
  0x36   : > { %1475 = vmatpush.bf16.msrb.mxu3 %v2469_v51  ;;  %759 = vmatmul.bf16.vlgmr.msra.gmra.mxu2 %v1933_v54  ;;  %v1946_v51 = vld [vmem:[%s2714_s12 + $0x50] sm:$0xf0]  ;;  %v2463_v54 = vld [vmem:[%s3186_s3 + $0x148] sm:$0xff]  ;;  %v2462_v59 = vld [vmem:[%s3186_s3 + $0x140] sm:$0xff] }
  0x37   : > { %v1949_v55 = vor.u32 %v2386_v45, %v1946_v51  ;;  %v2442_v61 = vld [vmem:[%s3187_s4 + $0x60] sm:$0xff]  ;;  %v2473_v13 = vld [vmem:[%s3187_s4 + $0x98] sm:$0xff]  ;;  %v2439_v14 = vld [vmem:[%s3187_s4 + $0x48] sm:$0xff] }
  0x38   : > { %723 = vmatpush.bf16.msrb.mxu1 %v2396_v52  ;;  %987 = vmatpush.bf16.msrb.mxu0 %v2436_v53  ;;  %v2072_v52 = vld [vmem:[%s2797_s9 + $0x40] sm:$0xf]  ;;  %v2419_v53 = vld [vmem:[%s2797_s9 + $0x4c] sm:$0xf0]  ;;  %v2388_v4 = vld [vmem:[%s2714_s12 + $0x64] sm:$0xf] }
  0x39   : > { %1447 = vmatpush.bf16.msrb.mxu2 %v2460_v0  ;;  %v2073_v56 = vor.u32 %v2419_v53, %v2072_v52  ;;  %v2474_v62 = vld [vmem:[%s3187_s4 + $0xa0] sm:$0xff]  ;;  %v2441_v0 = vld [vmem:[%s3187_s4 + $0x58] sm:$0xff]  ;;  %v2472_v15 = vld [vmem:[%s3187_s4 + $0x90] sm:$0xff] }
  0x3a   : > { %1476 = vmatpush.bf16.msrb.mxu3 %v2468_v1  ;;  %v2385_v1 = vld [vmem:[%s2714_s12 + $0x2c] sm:$0xf0]  ;;  %v2232_v22 = vld [vmem:[%s2980_s10] sm:$0xf]  ;;  %v2420_v45 = vld [vmem:[%s2797_s9 + $0x64] sm:$0xf] }
  0x3b   : > { %v1937_v5 = vor.u32 %v2385_v1, %v1936_v63  ;;  %v2387_v19 = vld [vmem:[%s2714_s12 + $0x4c] sm:$0xf0]  ;;  %v1952_v43 = vld [vmem:[%s2714_s12 + $0x60] sm:$0xf]  ;;  %v2082_v53 = vld [vmem:[%s2797_s9 + $0x70] sm:$0xf0] }
  0x3c   : > { %724 = vmatpush.bf16.msrb.mxu1 %v2395_v2  ;;  %988 = vmatpush.bf16.msrb.mxu0 %v2435_v3  ;;  %v2416_v2 = vld [vmem:[%s2797_s9 + $0x24] sm:$0xf]  ;;  %v2066_v3 = vld [vmem:[%s2797_s9 + $0x30] sm:$0xf0]  ;;  %v2389_v44 = vld [vmem:[%s2714_s12 + $0x6c] sm:$0xf0]  ;;  %v2085_v63 = vor.u32 %v2420_v45, %v2082_v53 }
  0x3d   : > { %1448 = vmatpush.bf16.msrb.mxu2 %v2459_v8  ;;  %v2069_v6 = vor.u32 %v2416_v2, %v2066_v3  ;;  %v2080_v8 = vld [vmem:[%s2797_s9 + $0x60] sm:$0xf]  ;;  %v2449_v1 = vld [vmem:[%s2980_s10 + $0x2c] sm:$0xf0] }
  0x3e   : > { %1477 = vmatpush.bf16.msrb.mxu3 %v2467_v9  ;;  %v2421_v9 = vld [vmem:[%s2797_s9 + $0x6c] sm:$0xf0] }
  0x3f   : > { %v2081_v12 = vor.u32 %v2421_v9, %v2080_v8 }
  0x40   : > { %725 = vmatpush.bf16.msrb.mxu1 %v2394_v10  ;;  %989 = vmatpush.bf16.msrb.mxu0 %v2434_v11  ;;  %v2440_v10 = vld [vmem:[%s3187_s4 + $0x50] sm:$0xff]  ;;  %v1957_v11 = vor.u32 %v2388_v4, %v1954_v7  ;;  %v2448_v4 = vld [vmem:[%s2980_s10 + $0x24] sm:$0xf] }
  0x41   : > { %1449 = vmatpush.bf16.msrb.mxu2 %v2458_v16  ;;  %v2438_v16 = vld [vmem:[%s3187_s4 + $0x40] sm:$0xff] }
  0x42   : > { %1478 = vmatpush.bf16.msrb.mxu3 %v2466_v30  ;;  %v2470_v30 = vld [vmem:[%s3187_s4 + $0x80] sm:$0xff] }
  0x43   : > { %570 = vmatmul.bf16.gmra.mxu0 %v502_v20  ;;  %580 = vmatmul.bf16.gmra.mxu1 %v504_v21  ;;  %v2418_v20 = vld [vmem:[%s2797_s9 + $0x44] sm:$0xf]  ;;  %v2074_v21 = vld [vmem:[%s2797_s9 + $0x50] sm:$0xf0] }
  0x44   : > { %726 = vmatpush.bf16.msrb.mxu1 %v2393_v17  ;;  %990 = vmatpush.bf16.msrb.mxu0 %v2433_v18  ;;  %v2471_v17 = vld [vmem:[%s3187_s4 + $0x88] sm:$0xff]  ;;  %v1944_v18 = vld [vmem:[%s2714_s12 + $0x40] sm:$0xf]  ;;  %v2077_v24 = vor.u32 %v2418_v20, %v2074_v21  ;;  %s281_s12 = sand.u32 1, %s2591_s22  }
  0x45   : > { %1450 = vmatpush.bf16.msrb.mxu2 %v2457_v25  ;;  %970 = vmatmul.bf16.gmra.mxu3 %v2065_v29  ;;  %v1945_v23 = vor.u32 %v2387_v19, %v1944_v18  ;;  %v2447_v25 = vld [vmem:[%s2980_s10 + $0xc] sm:$0xf0]  ;;  %v1516_v18 = vld [vmem:[%s2980_s10 + $0x20] sm:$0xf]  ;;  %s1779_s25 = scalar_lea.sflag [#allocation3], %s281_s12 }
  0x46   : > { %764 = vmatmul.bf16.gmra.mxu2 %v1941_v28  ;;  %1479 = vmatpush.bf16.msrb.mxu3 %v2465_v34  ;;  %v2233_v28 = vor.u32 %v2447_v25, %v2232_v22  ;;  %v1514_v34 = vld [vmem:[%s2980_s10 + $0x10] sm:$0xf] }
  0x47   : > { %v1546_v42 = vshll.u32 %v1514_v34, 16  ;;  %v1518_v19 = vld [vmem:[%s2980_s10 + $0x30] sm:$0xf] }
  0x48   : > { %727 = vmatpush.bf16.msrb.mxu1 %v2392_v26  ;;  %991 = vmatpush.bf16.msrb.mxu0 %v2432_v27  ;;  %v2446_v26 = vld [vmem:[%s2980_s10 + $0x4] sm:$0xf]  ;;  %v2234_v27 = vld [vmem:[%s2980_s10 + $0x10] sm:$0xf0] }
  0x49   : > { %1451 = vmatpush.bf16.msrb.mxu2 %v2456_v33  ;;  %v2237_v29 = vor.u32 %v2446_v26, %v2234_v27  ;;  %v1512_v33 = vld [vmem:[%s2980_s10] sm:$0xf] }
  0x4a   : > { %1480 = vmatpush.bf16.msrb.mxu3 %v2464_v41  ;;  %v1532_v40 = vshll.u32 %v1512_v33, 16  ;;  %v1543_v41 = vshrl.u32 %v1514_v34, 16 }
  0x4c   : > { %728 = vmatpush.bf16.msrb.mxu1 %v2391_v31  ;;  %992 = vmatpush.bf16.msrb.mxu0 %v2431_v32  ;;  %v1023_v31 = vld [vmem:[%s2797_s9] sm:$0xf]  ;;  %v1025_v32 = vld [vmem:[%s2797_s9 + $0x10] sm:$0xf] }
  0x4d   : > { %1452 = vmatpush.bf16.msrb.mxu2 %v2455_v35  ;;  %v1040_v35 = vshrl.u32 %v1023_v31, 16 }
  0x4e   : > { %1481 = vmatpush.bf16.msrb.mxu3 %v2463_v54 }
  0x50   : > { %729 = vmatpush.bf16.msrb.mxu1 %v2390_v36  ;;  %993 = vmatpush.bf16.msrb.mxu0 %v2430_v37  ;;  %v1043_v36 = vshll.u32 %v1023_v31, 16  ;;  %v1054_v37 = vshrl.u32 %v1025_v32, 16  ;;  %v1574_v31 = vshll.u32 %v1518_v19, 16 }
  0x51   : > { %1453 = vmatpush.bf16.msrb.mxu2 %v2454_v58  ;;  %v1513_v58 = vld [vmem:[%s2980_s10 + $0x8] sm:$0x1] }
  0x52   : > { %1482 = vmatpush.bf16.msrb.mxu3 %v2462_v59  ;;  %v1056_v51 = vrot.slane %v1054_v37, 4  ;;  %v1515_v59 = vld [vmem:[%s2980_s10 + $0x18] sm:$0x1]  ;;  %v1538_v7 = vshll.u32 %v1513_v58, 16  ;;  %v1576_v45 = vrot.slane %v1574_v31, 5 }
  0x53   : > { %730 = vmatmul.bf16.vlgmr.msrb.gmra.mxu1 %v1929_v49  ;;  %994 = vmatmul.bf16.vlgmr.msrb.gmra.mxu0 %v2061_v50  ;;  %v1042_v49 = vrot.slane %v1040_v35, 4  ;;  %v1045_v50 = vrot.slane %v1043_v36, 5  ;;  %v1552_v9 = vshll.u32 %v1515_v59, 16  ;;  %v1028_v36 = vld [vmem:[%s2797_s9 + $0x28] sm:$0x1] }
  0x54   : > { %1232 = vmatpush.bf16.msra.mxu1 %v2445_v38  ;;  %1721 = vmatpush.bf16.msra.mxu0 %v2477_v39  ;;  %v1057_v38 = vshll.u32 %v1025_v32, 16  ;;  %v1540_v21 = vrot.slane %v1538_v7, 5 }
  0x55   : > { %975 = vmatmul.bf16.gmra.mxu3 %v2073_v56  ;;  %2487 = vmatpush.bf16.msra.mxu2 %v2477_v39  ;;  %v1529_v39 = vshrl.u32 %v1512_v33, 16  ;;  %v1545_v56 = vrot.slane %v1543_v41, 4  ;;  %v1046_v2 = vor.u32 %v1045_v50, %v1042_v49  ;;  %v1030_v41 = vld [vmem:[%s2797_s9 + $0x38] sm:$0x1] }
  0x56   : > { %769 = vmatmul.bf16.gmra.mxu2 %v1949_v55  ;;  %v1059_v52 = vrot.slane %v1057_v38, 5  ;;  %v1534_v55 = vrot.slane %v1532_v40, 5 }
  0x57   : > { %v1531_v54 = vrot.slane %v1529_v39, 4 }
  0x58   : > { %1233 = vmatpush.bf16.msra.mxu1 %v2444_v46  ;;  %1722 = vmatpush.bf16.msra.mxu0 %v2476_v47  ;;  %v1024_v46 = vld [vmem:[%s2797_s9 + $0x8] sm:$0x1]  ;;  %v1060_v3 = vor.u32 %v1059_v52, %v1056_v51 }
  0x59   : > { %2488 = vmatpush.bf16.msra.mxu2 %v2476_v47  ;;  %v1026_v47 = vld [vmem:[%s2797_s9 + $0x18] sm:$0x1] }
  0x5c   : > { %1234 = vmatpush.bf16.msra.mxu1 %v2443_v57  ;;  %1723 = vmatpush.bf16.msra.mxu0 %v2475_v60  ;;  %v1548_v57 = vrot.slane %v1546_v42, 5 }
  0x5d   : > { %2489 = vmatpush.bf16.msra.mxu2 %v2475_v60  ;;  %v1049_v60 = vshll.u32 %v1024_v46, 16  ;;  %v1517_v46 = vld [vmem:[%s2980_s10 + $0x28] sm:$0x1] }
  0x5e   : > { %v1549_v8 = vor.u32 %v1548_v57, %v1545_v56  ;;  %v1091_v56 = vshll.u32 %v1030_v41, 16  ;;  %v1566_v58 = vshll.u32 %v1517_v46, 16  ;;  %v1521_v41 = vld [vmem:[%s2980_s10 + $0x48] sm:$0x1]  ;;  %v1523_v46 = vld [vmem:[%s2980_s10 + $0x58] sm:$0x1] }
  0x60   : > { %1235 = vmatpush.bf16.msra.mxu1 %v2442_v61  ;;  %1724 = vmatpush.bf16.msra.mxu0 %v2474_v62  ;;  %v1063_v61 = vshll.u32 %v1026_v47, 16  ;;  %v1550_v22 = vrot.slane %v1549_v8, 4  ;;  %v1519_v47 = vld [vmem:[%s2980_s10 + $0x38] sm:$0x1]  ;;  %v1568_v8 = vrot.slane %v1566_v58, 5 }
  0x61   : > { %2490 = vmatpush.bf16.msra.mxu2 %v2474_v62  ;;  %v1953_v62 = vor.u32 %v2389_v44, %v1952_v43 }
  0x63   : > { %735 = vmatmul.bf16.gmra.mxu1 %v1937_v5  ;;  %999 = vmatmul.bf16.gmra.mxu0 %v2069_v6  ;;  %v2242_v5 = vld [vmem:[%s2980_s10 + $0x30] sm:$0xf0]  ;;  %v1535_v6 = vor.u32 %v1534_v55, %v1531_v54  ;;  %v1077_v54 = vshll.u32 %v1028_v36, 16  ;;  %v1526_v36 = vld [vmem:[%s2980_s10 + $0x70] sm:$0xf] }
  0x64   : > { %1236 = vmatpush.bf16.msra.mxu1 %v2441_v0  ;;  %1725 = vmatpush.bf16.msra.mxu0 %v2473_v13  ;;  %v2240_v0 = vld [vmem:[%s2980_s10 + $0x20] sm:$0xf] }
  0x65   : > { %980 = vmatmul.bf16.gmra.mxu3 %v2081_v12  ;;  %2491 = vmatpush.bf16.msra.mxu2 %v2473_v13  ;;  %v1027_v12 = vld [vmem:[%s2797_s9 + $0x20] sm:$0xf]  ;;  %v1029_v13 = vld [vmem:[%s2797_s9 + $0x30] sm:$0xf]  ;;  %v1536_v20 = vrot.slane %v1535_v6, 4  ;;  %v1093_v6 = vrot.slane %v1091_v56, 5 }
  0x66   : > { %774 = vmatmul.bf16.gmra.mxu2 %v1957_v11  ;;  %v1065_v11 = vrot.slane %v1063_v61, 5  ;;  %v1071_v25 = vshll.u32 %v1027_v12, 16  ;;  %v1082_v26 = vshrl.u32 %v1029_v13, 16  ;;  %v1085_v27 = vshll.u32 %v1029_v13, 16  ;;  %v2248_v61 = vld [vmem:[%s2980_s10 + $0x40] sm:$0xf] }
  0x67   : > { %v1541_v34 = vsel %vm2749_vm2, %v1536_v20, %v1540_v21  ;;  %v2452_v56 = vld [vmem:[%s2980_s10 + $0x64] sm:$0xf] }
  0x68   : > { %1237 = vmatpush.bf16.msra.mxu1 %v2440_v10  ;;  %1726 = vmatpush.bf16.msra.mxu0 %v2472_v15  ;;  %v1051_v10 = vrot.slane %v1049_v60, 5  ;;  %v1073_v38 = vrot.slane %v1071_v25, 5  ;;  %v1084_v39 = vrot.slane %v1082_v26, 4  ;;  %v1087_v40 = vrot.slane %v1085_v27, 5 }
  0x69   : > { %2492 = vmatpush.bf16.msra.mxu2 %v2472_v15  ;;  %v2245_v15 = vor.u32 %v2448_v4, %v2242_v5  ;;  %v1657_v51 = vunpack.c.l.b16 %v1541_v34  ;;  %v1580_v60 = vshll.u32 %v1519_v47, 16  ;;  %v1079_v4 = vrot.slane %v1077_v54, 5  ;;  %v2256_v54 = vld [vmem:[%s2980_s10 + $0x60] sm:$0xf] }
  0x6a   : > { %v1088_v55 = vor.u32 %v1087_v40, %v1084_v39 }
  0x6c   : > { %1238 = vmatpush.bf16.msra.mxu1 %v2439_v14  ;;  %1727 = vmatpush.bf16.msra.mxu0 %v2471_v17  ;;  %v2241_v14 = vor.u32 %v2449_v1, %v2240_v0  ;;  %v2451_v0 = vld [vmem:[%s2980_s10 + $0x4c] sm:$0xf0]  ;;  %v2450_v1 = vld [vmem:[%s2980_s10 + $0x44] sm:$0xf]  ;;  %v1089_v5 = vrot.slane %v1088_v55, 4 }
  0x6d   : > { %2493 = vmatpush.bf16.msra.mxu2 %v2471_v17  ;;  %v1061_v17 = vrot.slane %v1060_v3, 4  ;;  %v2453_v55 = vld [vmem:[%s2980_s10 + $0x6c] sm:$0xf0] }
  0x6f   : > { %v1066_v33 = vsel %vm2749_vm2, %v1061_v17, %v1065_v11  ;;  %v1031_v11 = vld [vmem:[%s2797_s9 + $0x40] sm:$0xf] }
  0x70   : > { %1239 = vmatpush.bf16.msra.mxu1 %v2438_v16  ;;  %1728 = vmatpush.bf16.msra.mxu0 %v2470_v30  ;;  %v1047_v16 = vrot.slane %v1046_v2, 4  ;;  %v1169_v50 = vunpack.c.l.b16 %v1066_v33  ;;  %v2250_v2 = vld [vmem:[%s2980_s10 + $0x50] sm:$0xf0]  ;;  %v1099_v20 = vshll.u32 %v1031_v11, 16 }
  0x71   : > { %2494 = vmatpush.bf16.msra.mxu2 %v2470_v30  ;;  %v1571_v30 = vshrl.u32 %v1518_v19, 16  ;;  %v2253_v13 = vor.u32 %v2450_v1, %v2250_v2  ;;  %v1096_v19 = vshrl.u32 %v1031_v11, 16  ;;  %v1608_v1 = vshll.u32 %v1523_v46, 16  ;;  %v1525_v2 = vld [vmem:[%s2980_s10 + $0x68] sm:$0x1] }
  0x72   : > { %v1052_v32 = vsel %vm2749_vm2, %v1047_v16, %v1051_v10  ;;  %v1582_v10 = vrot.slane %v1580_v60, 5  ;;  %v1522_v16 = vld [vmem:[%s2980_s10 + $0x50] sm:$0xf]  ;;  %v1101_v34 = vrot.slane %v1099_v20, 5  ;;  %v1036_v46 = vld [vmem:[%s2797_s9 + $0x68] sm:$0x1] }
  0x73   : > { %740 = vmatmul.bf16.gmra.mxu1 %v1945_v23  ;;  %1004 = vmatmul.bf16.gmra.mxu0 %v2077_v24  ;;  %v1554_v23 = vrot.slane %v1552_v9, 5  ;;  %v1068_v24 = vshrl.u32 %v1027_v12, 16  ;;  %v1573_v44 = vrot.slane %v1571_v30, 4  ;;  %v1168_v49 = vunpack.c.l.b16 %v1052_v32 }
  0x74   : > { %v2249_v12 = vor.u32 %v2451_v0, %v2248_v61  ;;  %v1599_v27 = vshrl.u32 %v1522_v16, 16  ;;  %v1098_v33 = vrot.slane %v1096_v19, 4 }
  0x75   : > { %1483 = vmatmul.bf16.vlgmr.msrb.gmra.mxu3 %v2237_v29  ;;  %v1560_v29 = vshll.u32 %v1516_v18, 16  ;;  %v1555_v35 = vsel %vm2749_vm2, %v1550_v22, %v1554_v23  ;;  %v1070_v37 = vrot.slane %v1068_v24, 4  ;;  %v1577_v59 = vor.u32 %v1576_v45, %v1573_v44 }
  0x76   : > { %1454 = vmatmul.bf16.vlgmr.msrb.gmra.mxu2 %v2233_v28  ;;  %v1557_v28 = vshrl.u32 %v1516_v18, 16  ;;  %v1658_v52 = vunpack.c.l.b16 %v1555_v35  ;;  %v1094_v18 = vsel %vm2749_vm2, %v1089_v5, %v1093_v6  ;;  %v1524_v35 = vld [vmem:[%s2980_s10 + $0x60] sm:$0xf]  ;;  %v1601_v44 = vrot.slane %v1599_v27, 4 }
  0x77   : > { %v1562_v43 = vrot.slane %v1560_v29, 5  ;;  %v1074_v53 = vor.u32 %v1073_v38, %v1070_v37  ;;  %v1578_v9 = vrot.slane %v1577_v59, 4  ;;  %v1171_v30 = vunpack.c.l.b16 %v1094_v18  ;;  %v1032_v37 = vld [vmem:[%s2797_s9 + $0x48] sm:$0x1]  ;;  %v1034_v38 = vld [vmem:[%s2797_s9 + $0x58] sm:$0x1] }
  0x78   : > { %v1559_v42 = vrot.slane %v1557_v28, 4  ;;  %v1602_v28 = vshll.u32 %v1522_v16, 16  ;;  %v1613_v47 = vshrl.u32 %v1524_v35, 16  ;;  %v1102_v58 = vor.u32 %v1101_v34, %v1098_v33 }
  0x79   : > { %v1075_v3 = vrot.slane %v1074_v53, 4  ;;  %v1583_v22 = vsel %vm2749_vm2, %v1578_v9, %v1582_v10  ;;  %v1105_v59 = vshll.u32 %v1032_v37, 16  ;;  %v1119_v61 = vshll.u32 %v1034_v38, 16  ;;  %v1527_v9 = vld [vmem:[%s2980_s10 + $0x78] sm:$0x1] }
  0x7a   : > { %v1563_v57 = vor.u32 %v1562_v43, %v1559_v42  ;;  %v1660_v32 = vunpack.c.l.b16 %v1583_v22  ;;  %v1604_v45 = vrot.slane %v1602_v28, 5  ;;  %v1103_v10 = vrot.slane %v1102_v58, 4  ;;  %v1035_v22 = vld [vmem:[%s2797_s9 + $0x60] sm:$0xf] }
  0x7b   : > { %v1080_v17 = vsel %vm2749_vm2, %v1075_v3, %v1079_v4  ;;  %v1615_v3 = vrot.slane %v1613_v47, 4  ;;  %v1107_v11 = vrot.slane %v1105_v59, 5  ;;  %v1610_v16 = vrot.slane %v1608_v1, 5  ;;  %v1038_v47 = vld [vmem:[%s2797_s9 + $0x78] sm:$0x1] }
  0x7c   : > { %v1564_v7 = vrot.slane %v1563_v57, 4  ;;  %v1170_v29 = vunpack.c.l.b16 %v1080_v17  ;;  %v2258_v57 = vld [vmem:[%s2980_s10 + $0x70] sm:$0xf0]  ;;  %v1605_v0 = vor.u32 %v1604_v45, %v1601_v44  ;;  %v1622_v17 = vshll.u32 %v1525_v2, 16 }
  0x7d   : > { %v1127_v33 = vshll.u32 %v1035_v22, 16  ;;  %v1147_v58 = vshll.u32 %v1038_v47, 16 }
  0x7e   : > { %v1569_v21 = vsel %vm2749_vm2, %v1564_v7, %v1568_v8  ;;  %v2257_v7 = vor.u32 %v2453_v55, %v2256_v54  ;;  %v2261_v8 = vor.u32 %v2452_v56, %v2258_v57  ;;  %v1606_v18 = vrot.slane %v1605_v0, 4 }
  0x7f   : > { %v1659_v31 = vunpack.c.l.b16 %v1569_v21  ;;  %v1636_v21 = vshll.u32 %v1527_v9, 16  ;;  %v1624_v27 = vrot.slane %v1622_v17, 5  ;;  %v1133_v56 = vshll.u32 %v1036_v46, 16 }
  0x80   : > { %v1611_v28 = vsel %vm2749_vm2, %v1606_v18, %v1610_v16 }
  0x81   : > { %v1666_v53 = vpack.c.b16 %v1660_v32, %v1659_v31  ;;  %v1638_v31 = vrot.slane %v1636_v21, 5  ;;  %v1124_v32 = vshrl.u32 %v1035_v22, 16 }
  0x83   : > { %745 = vmatmul.bf16.gmra.mxu1 %v1953_v62  ;;  %1009 = vmatmul.bf16.gmra.mxu0 %v2085_v63  ;;  %v1176_v62 = vpack.c.b16 %v1169_v50, %v1168_v49  ;;  %v1665_v63 = vpack.c.b16 %v1658_v52, %v1657_v51  ;;  %v1616_v49 = vshll.u32 %v1524_v35, 16  ;;  %v1627_v50 = vshrl.u32 %v1526_v36, 16 }
  0x84   : > { %v1630_v51 = vshll.u32 %v1526_v36, 16  ;;  %v1177_v52 = vpack.c.b16 %v1171_v30, %v1170_v29 }
  0x85   : > { %1488 = vmatmul.bf16.gmra.mxu3 %v2245_v15  ;;  %v1520_v15 = vld [vmem:[%s2980_s10 + $0x40] sm:$0xf]  ;;  %v1618_v4 = vrot.slane %v1616_v49, 5  ;;  %v1629_v5 = vrot.slane %v1627_v50, 4  ;;  %s2553_s10 = scalar_lea.hbm %s2552_s29, 64 }
  0x86   : > { %1459 = vmatmul.bf16.gmra.mxu2 %v2241_v14  ;;  %v1033_v14 = vld [vmem:[%s2797_s9 + $0x50] sm:$0xf]  ;;  %v1585_v25 = vshrl.u32 %v1520_v15, 16  ;;  %v1588_v26 = vshll.u32 %v1520_v15, 16  ;;  %v1632_v6 = vrot.slane %v1630_v51, 5  ;;  %p2554_p11 = scmp.ne.s32.totalorder %s2552_s29, %s2553_s10 }
  0x87   : > { %v1110_v23 = vshrl.u32 %v1033_v14, 16  ;;  %v1113_v24 = vshll.u32 %v1033_v14, 16  ;;  %v1619_v19 = vor.u32 %v1618_v4, %v1615_v3 }
  0x88   : > { %v1587_v42 = vrot.slane %v1585_v25, 4  ;;  %v1590_v43 = vrot.slane %v1588_v26, 5  ;;  %v1633_v20 = vor.u32 %v1632_v6, %v1629_v5  ;;  %p2555_p12 = pnand %p2554_p11, %p2676_p5 }
  0x89   : > { %v1112_v39 = vrot.slane %v1110_v23, 4  ;;  %v1115_v40 = vrot.slane %v1113_v24, 5  ;;  %v1037_v23 = vld [vmem:[%s2797_s9 + $0x70] sm:$0xf]  ;;  %v1108_v24 = vsel %vm2749_vm2, %v1103_v10, %v1107_v11  ;;  %v1620_v29 = vrot.slane %v1619_v19, 4  ;;  %s1884_s9 = sshll.u32 %s281_s12, 6 }
  0x8a   : > { %v1634_v30 = vrot.slane %v1633_v20, 4  ;;  %v1138_v34 = vshrl.u32 %v1037_v23, 16  ;;  %v1141_v35 = vshll.u32 %v1037_v23, 16  ;;  %v1172_v36 = vunpack.c.l.b16 %v1108_v24  ;;  %s3116_s15 = scalar_lea.vmem [#allocation2], %s1884_s9  ;;  %p2556_p13 = pneg %p2555_p12 }
  0x8b   : > { %v1116_v60 = vor.u32 %v1115_v40, %v1112_v39  ;;  %v1662_v39 = vunpack.c.l.b16 %v1611_v28  ;;  %v1625_v40 = vsel %vm2749_vm2, %v1620_v29, %v1624_v27  ;;  %s1791_s20 = sshll.u32 %s3116_s15, 4  ;;  %s2557_s9 = scalar_lea.hbm %s3189_s6, 128  ;;  %s1792_s20 = int_to_ptr.vmem [resolvable:$true] %s1791_s20 }
  0x8c   : > { %v1140_v44 = vrot.slane %v1138_v34, 4  ;;  %v1143_v45 = vrot.slane %v1141_v35, 5  ;;  %v1663_v49 = vunpack.c.l.b16 %v1625_v40  ;;  %p2559_p1 = scmp.lt.s32.totalorder %s2557_s9, %s2553_s10 }
  0x8e   : > { %v1144_v57 = vor.u32 %v1143_v45, %v1140_v44  ;;  %p2560_p2 = por %p2559_p1, %p2558_p0 }
  0x90   : > { %p2561_p3 = pnand %p2560_p2, %p2556_p13 }
  0x93   : > { %1240 = vmatmul.bf16.vlgmr.msra.gmra.mxu1 %v1176_v62  ;;  %1729 = vmatmul.bf16.vlgmr.msra.gmra.mxu0 %v1665_v63  ;;  %v1591_v62 = vor.u32 %v1590_v43, %v1587_v42  ;;  %v1594_v63 = vshll.u32 %v1521_v41, 16  ;;  %v1639_v41 = vsel %vm2749_vm2, %v1634_v30, %v1638_v31  ;;  %v1126_v42 = vrot.slane %v1124_v32, 4 }
  0x94   : > { %v1129_v43 = vrot.slane %v1127_v33, 5  ;;  %v1664_v50 = vunpack.c.l.b16 %v1639_v41 }
  0x95   : > { %1493 = vmatmul.bf16.gmra.mxu3 %v2253_v13  ;;  %v1121_v13 = vrot.slane %v1119_v61, 5  ;;  %v1592_v14 = vrot.slane %v1591_v62, 4  ;;  %v1596_v15 = vrot.slane %v1594_v63, 5  ;;  %v1135_v61 = vrot.slane %v1133_v56, 5 }
  0x96   : > { %1464 = vmatmul.bf16.gmra.mxu2 %v2249_v12  ;;  %v1117_v12 = vrot.slane %v1116_v60, 4  ;;  %v1130_v55 = vor.u32 %v1129_v43, %v1126_v42  ;;  %v1668_v59 = vpack.c.b16 %v1664_v50, %v1663_v49  ;;  %v1145_v62 = vrot.slane %v1144_v57, 4 }
  0x97   : > { %v1597_v26 = vsel %vm2749_vm2, %v1592_v14, %v1596_v15  ;;  %v1149_v63 = vrot.slane %v1147_v58, 5 }
  0x98   : > { %v1122_v25 = vsel %vm2749_vm2, %v1117_v12, %v1121_v13  ;;  %v1661_v38 = vunpack.c.l.b16 %v1597_v26  ;;  %v1131_v60 = vrot.slane %v1130_v55, 4 }
  0x99   : > { %v1173_v37 = vunpack.c.l.b16 %v1122_v25  ;;  %v1150_v3 = vsel %vm2749_vm2, %v1145_v62, %v1149_v63 }
  0x9a   : > { %v1136_v2 = vsel %vm2749_vm2, %v1131_v60, %v1135_v61 }
  0x9b   : > { %v1178_v51 = vpack.c.b16 %v1173_v37, %v1172_v36  ;;  %v1174_v6 = vunpack.c.l.b16 %v1136_v2 }
  0xa3   : > { %1245 = vmatmul.bf16.gmra.mxu1 %v1177_v52  ;;  %1734 = vmatmul.bf16.gmra.mxu0 %v1666_v53  ;;  %v1667_v52 = vpack.c.b16 %v1662_v39, %v1661_v38 }
  0xa5   : > { %1498 = vmatmul.bf16.gmra.mxu3 %v2261_v8 }
  0xa6   : > { %1469 = vmatmul.bf16.gmra.mxu2 %v2257_v7  ;;  %v1175_v7 = vunpack.c.l.b16 %v1150_v3 }
  0xa8   : > { %v1179_v8 = vpack.c.b16 %v1175_v7, %v1174_v6 }
  0xb0   : > { %v566_v53 = vpop.f32.mrf.mxu0  ;;  %v576_v54 = vpop.f32.mrf.mxu1 }
  0xb3   : > { %1250 = vmatmul.bf16.gmra.mxu1 %v1178_v51  ;;  %1739 = vmatmul.bf16.gmra.mxu0 %v1667_v52 }
  0xb6   : > { %1744 = vmatmul.bf16.vlgmr.msra.gmra.mxu2 %v1668_v59 }
  0xb8   : > { %v568_v0 = vpop.f32.mrf.mxu0  ;;  %v578_v1 = vpop.f32.mrf.mxu1 }
  0xb9   : > { %v760_v4 = vpop.f32.mrf.mxu2  ;;  %v966_v5 = vpop.f32.mrf.mxu3 }
  0xc0   : > { %v571_v9 = vpop.f32.mrf.mxu0  ;;  %v581_v10 = vpop.f32.mrf.mxu1 }
  0xc1   : > { %v762_v11 = vpop.f32.mrf.mxu2  ;;  %v3072_v12 = vpop.f32.mrf.mxu3 }
  0xc3   : > { %1255 = vmatmul.bf16.gmra.mxu1 %v1179_v8 }
  0xc8   : > { %v573_v13 = vpop.f32.mrf.mxu0  ;;  %v583_v14 = vpop.f32.mrf.mxu1 }
  0xc9   : > { %v765_v15 = vpop.f32.mrf.mxu2  ;;  %v3074_v16 = vpop.f32.mrf.mxu3 }
  0xd0   : > { %v731_v17 = vpop.f32.mrf.mxu1  ;;  %v995_v18 = vpop.f32.mrf.mxu0 }
  0xd1   : > { %v732_v48 = vadd.f32 %v731_v17, %v566_v53  ;;  %v767_v19 = vpop.f32.mrf.mxu2  ;;  %v3076_v20 = vpop.f32.mrf.mxu3 }
  0xd3   : > { %v761_v21 = vadd.f32 %v760_v4, %v732_v48 }
  0xd8   : > { %v733_v22 = vpop.f32.mrf.mxu1  ;;  %v997_v23 = vpop.f32.mrf.mxu0 }
  0xd9   : > { %v734_v24 = vadd.f32 %v733_v22, %v568_v0  ;;  %v770_v25 = vpop.f32.mrf.mxu2  ;;  %v3078_v26 = vpop.f32.mrf.mxu3  ;;  %v996_v0 = vadd.f32 %v995_v18, %v966_v5 }
  0xdb   : > { %v763_v27 = vadd.f32 %v762_v11, %v734_v24  ;;  %v998_v11 = vadd.f32 %v997_v23, %v3072_v12 }
  0xe0   : > { %v736_v28 = vpop.f32.mrf.mxu1  ;;  %v1000_v29 = vpop.f32.mrf.mxu0 }
  0xe1   : > { %v737_v30 = vadd.f32 %v736_v28, %v571_v9  ;;  %v772_v31 = vpop.f32.mrf.mxu2  ;;  %v3080_v32 = vpop.f32.mrf.mxu3  ;;  %v1001_v22 = vadd.f32 %v1000_v29, %v3074_v16 }
  0xe3   : > { %v766_v33 = vadd.f32 %v765_v15, %v737_v30 }
  0xe5   : > { %v1017_v23 = vadd.f32 %v1001_v22, %v766_v33 }
  0xe8   : > { %v738_v34 = vpop.f32.mrf.mxu1  ;;  %v3082_v35 = vpop.f32.mrf.mxu0 }
  0xe9   : > { %v739_v36 = vadd.f32 %v738_v34, %v573_v13  ;;  %v775_v37 = vpop.f32.mrf.mxu2  ;;  %v3086_v39 = vpop.f32.mrf.mxu3 }
  0xeb   : > { %v3084_v38 = vadd.f32 %v767_v19, %v739_v36 }
  0xf0   : > { %v741_v40 = vpop.f32.mrf.mxu1  ;;  %v3088_v41 = vpop.f32.mrf.mxu0 }
  0xf1   : > { %v742_v42 = vadd.f32 %v741_v40, %v576_v54  ;;  %v777_v43 = vpop.f32.mrf.mxu2  ;;  %v3092_v45 = vpop.f32.mrf.mxu3 }
  0xf3   : > { %v3090_v44 = vadd.f32 %v770_v25, %v742_v42 }
  0xf8   : > { %v743_v46 = vpop.f32.mrf.mxu1  ;;  %v3094_v47 = vpop.f32.mrf.mxu0 }
  0xf9   : > { %v744_v49 = vadd.f32 %v743_v46, %v578_v1  ;;  %v1455_v50 = vpop.f32.mrf.mxu2  ;;  %v1484_v52 = vpop.f32.mrf.mxu3  ;;  %v1015_v1 = vadd.f32 %v996_v0, %v761_v21  ;;  %v1008_v0 = vadd.f32 %v3094_v47, %v3080_v32 }
  0xfa   : > { %v1485_v4 = vadd.f32 %v1484_v52, %v1455_v50  ;;  %v1006_v52 = vadd.f32 %v3088_v41, %v3078_v26 }
  0xfb   : > { %v3096_v51 = vadd.f32 %v772_v31, %v744_v49 }
  0xfd   : > { %v1020_v41 = vadd.f32 %v1008_v0, %v3096_v51 }
 0x100   : > { %v746_v53 = vpop.f32.mrf.mxu1  ;;  %v3098_v55 = vpop.f32.mrf.mxu0 }
 0x101   : > { %v747_v56 = vadd.f32 %v746_v53, %v581_v10  ;;  %v1457_v57 = vpop.f32.mrf.mxu2  ;;  %v1486_v60 = vpop.f32.mrf.mxu3  ;;  %v3112_v10 = vld [vmem:[%s3188_s5] ss:$0 sm:$0xff] }
 0x102   : > { %v1487_v18 = vadd.f32 %v1486_v60, %v1457_v57 }
 0x103   : > { %v3100_v54 = vadd.f32 %v775_v37, %v747_v56  ;;  %v1003_v37 = vadd.f32 %v3082_v35, %v3076_v20  ;;  %v1019_v35 = vadd.f32 %v1006_v52, %v3090_v44 }
 0x105   : > { %v1018_v29 = vadd.f32 %v1003_v37, %v3084_v38 }
 0x108   : > { %v748_v58 = vpop.f32.mrf.mxu1  ;;  %v3102_v59 = vpop.f32.mrf.mxu0 }
 0x109   : > { %v749_v61 = vadd.f32 %v748_v58, %v583_v14  ;;  %v1460_v62 = vpop.f32.mrf.mxu2  ;;  %v1489_v8 = vpop.f32.mrf.mxu3  ;;  %v1016_v14 = vadd.f32 %v998_v11, %v763_v27 }
 0x10a   : > { %v1490_v30 = vadd.f32 %v1489_v8, %v1460_v62 }
 0x10b   : > { %v3104_v63 = vadd.f32 %v777_v43, %v749_v61 }
 0x110   : > { %v1241_v2 = vpop.f32.mrf.mxu1  ;;  %v1730_v3 = vpop.f32.mrf.mxu0 }
 0x111   : > { %v1261_v6 = vadd.f32 %v1241_v2, %v1015_v1  ;;  %v1462_v7 = vpop.f32.mrf.mxu2  ;;  %v1491_v24 = vpop.f32.mrf.mxu3 }
 0x112   : > { %v1492_v46 = vadd.f32 %v1491_v24, %v1462_v7 }
 0x113   : > { %v1504_v9 = vadd.f32 %v1485_v4, %v1261_v6 }
 0x115   : > { %v1750_v13 = vadd.f32 %v1730_v3, %v1504_v9  ;;  %v1011_v9 = vadd.f32 %v3098_v55, %v3086_v39 }
 0x117   : > { %v1762_v5 = vadd.f32 %v3112_v10, %v1750_v13  ;;  %v1021_v47 = vadd.f32 %v1011_v9, %v3100_v54 }
 0x118   : > { %v1243_v15 = vpop.f32.mrf.mxu1  ;;  %v1732_v17 = vpop.f32.mrf.mxu0 }
 0x119   : > { %1770 = vst [vmem:[%s3116_s15] sm:$0xff] %v1762_v5  ;;  %v1262_v48 = vadd.f32 %v1243_v15, %v1016_v14  ;;  %v1465_v19 = vpop.f32.mrf.mxu2  ;;  %v1494_v42 = vpop.f32.mrf.mxu3 }
 0x11a   : > { %v1495_v60 = vadd.f32 %v1494_v42, %v1465_v19 }
 0x11b   : > { %v1505_v21 = vadd.f32 %v1487_v18, %v1262_v48 }
 0x11d   : > { %v1751_v25 = vadd.f32 %v1732_v17, %v1505_v21  ;;  %v1013_v17 = vadd.f32 %v3102_v59, %v3092_v45 }
 0x11f   : > { %v1763_v12 = vadd.f32 %v3112_v10, %v1751_v25  ;;  %v1022_v55 = vadd.f32 %v1013_v17, %v3104_v63 }
 0x120   : > { %v1246_v27 = vpop.f32.mrf.mxu1  ;;  %v1735_v28 = vpop.f32.mrf.mxu0 }
 0x121   : > { %1771 = vst [vmem:[%s3116_s15 + $0x8] sm:$0xff] %v1763_v12  ;;  %v1263_v31 = vadd.f32 %v1246_v27, %v1017_v23  ;;  %v1467_v36 = vpop.f32.mrf.mxu2  ;;  %v1496_v61 = vpop.f32.mrf.mxu3 }
 0x122   : > { %v1497_v4 = vadd.f32 %v1496_v61, %v1467_v36 }
 0x123   : > { %v1506_v34 = vadd.f32 %v1490_v30, %v1263_v31 }
 0x125   : > { %v1752_v40 = vadd.f32 %v1735_v28, %v1506_v34 }
 0x127   : > { %v1764_v16 = vadd.f32 %v3112_v10, %v1752_v40 }
 0x128   : > { %v1248_v43 = vpop.f32.mrf.mxu1  ;;  %v1737_v33 = vpop.f32.mrf.mxu0 }
 0x129   : > { %1772 = vst [vmem:[%s3116_s15 + $0x10] sm:$0xff] %v1764_v16  ;;  %v1264_v49 = vadd.f32 %v1248_v43, %v1018_v29  ;;  %v1470_v56 = vpop.f32.mrf.mxu2  ;;  %v1499_v8 = vpop.f32.mrf.mxu3 }
 0x12a   : > { %v1500_v51 = vadd.f32 %v1499_v8, %v1470_v56 }
 0x12b   : > { %v1507_v50 = vadd.f32 %v1492_v46, %v1264_v49 }
 0x12d   : > { %v1753_v53 = vadd.f32 %v1737_v33, %v1507_v50 }
 0x12f   : > { %v1765_v20 = vadd.f32 %v3112_v10, %v1753_v53 }
 0x130   : > { %v1251_v57 = vpop.f32.mrf.mxu1  ;;  %v1740_v58 = vpop.f32.mrf.mxu0 }
 0x131   : > { %1773 = vst [vmem:[%s3116_s15 + $0x18] sm:$0xff] %v1765_v20  ;;  %v1265_v38 = vadd.f32 %v1251_v57, %v1019_v35  ;;  %v1472_v2 = vpop.f32.mrf.mxu2  ;;  %v1501_v48 = vpop.f32.mrf.mxu3 }
 0x132   : > { %v1502_v19 = vadd.f32 %v1501_v48, %v1472_v2 }
 0x133   : > { %v1508_v62 = vadd.f32 %v1495_v60, %v1265_v38 }
 0x135   : > { %v1754_v1 = vadd.f32 %v1740_v58, %v1508_v62 }
 0x137   : > { %v1766_v26 = vadd.f32 %v3112_v10, %v1754_v1 }
 0x138   : > { %v1253_v3 = vpop.f32.mrf.mxu1  ;;  %v1742_v6 = vpop.f32.mrf.mxu0 }
 0x139   : > { %1774 = vst [vmem:[%s3116_s15 + $0x20] sm:$0xff] %v1766_v26  ;;  %v1266_v44 = vadd.f32 %v1253_v3, %v1020_v41  ;;  %v1745_v14 = vpop.f32.mrf.mxu2 }
 0x13b   : > { %v1509_v7 = vadd.f32 %v1497_v4, %v1266_v44 }
 0x13d   : > { %v1755_v11 = vadd.f32 %v1742_v6, %v1509_v7 }
 0x13f   : > { %v1767_v32 = vadd.f32 %v3112_v10, %v1755_v11 }
 0x140   : > { %v1256_v13 = vpop.f32.mrf.mxu1 }
 0x141   : > { %1775 = vst [vmem:[%s3116_s15 + $0x28] sm:$0xff] %v1767_v32  ;;  %v1267_v5 = vadd.f32 %v1256_v13, %v1021_v47  ;;  %v1747_v45 = vpop.f32.mrf.mxu2 }
 0x143   : > { %v1510_v15 = vadd.f32 %v1500_v51, %v1267_v5 }
 0x145   : > { %v1756_v18 = vadd.f32 %v1745_v14, %v1510_v15 }
 0x147   : > { %v1768_v39 = vadd.f32 %v3112_v10, %v1756_v18 }
 0x148   : > { %v1258_v54 = vpop.f32.mrf.mxu1 }
 0x149   : > { %1776 = vst [vmem:[%s3116_s15 + $0x30] sm:$0xff] %v1768_v39  ;;  %v1268_v21 = vadd.f32 %v1258_v54, %v1022_v55 }
 0x14b   : > { %v1511_v22 = vadd.f32 %v1502_v19, %v1268_v21 }
 0x14d   : > { %v1757_v59 = vadd.f32 %v1747_v45, %v1511_v22 }
 0x14f   : > { %v1769_v24 = vadd.f32 %v3112_v10, %v1757_v59 }
 0x151   : > { %1777 = vst [vmem:[%s3116_s15 + $0x38] sm:$0xff] %v1769_v24 }
 0x152   : > { %2564 = shalt.err (!%p2561_p3)
}
 0x153   : > { %s2601_s12 = smov 128   ;;  %s2602_s15 = smov 8  }
 0x154   : > { %2495 = dma.vmem_to_hbm [thread:$0]  (%p2676_p5), %s1792_s20, 1024, %s1794_s26, %s1779_s25, %s2601_s12, %s2601_s12, %s2602_s15  }
 0x155 PF: > { %p2501_p4 = scmp.ge.s32.totalorder %s2599_s24, 2  ;;  %s1808_s16 = sand.u32 1, %s2587_s21  }
 0x156   : > { %s1809_s17 = scalar_lea.sflag [#allocation3], %s1808_s16 }
 0x157   : > { %p2498_p7 = pnand %p2501_p4, %p2680_p6 }
 0x159   : > { %p2499_p8 = pneg %p2498_p7 }
 0x15b   : > { %2582 = dma.done.wait (%p2499_p8), %s1809_s17, 1024  }
 0x15c   : > { %2584 = vsyncadd (%p2499_p8), %s1809_s17, 4294966272  ;;  %p16_p9 = scmp.ge.s32.totalorder %s2663_s27, 4   ;;  %s3194_s21 = smov %s2591_s22 }
 0x15d   : > { %s3195_s22 = smov %s2595_s23  ;;  %s3196_s23 = smov %s2674_s30 }
 0x15e   : > { %s3197_s24 = smov %s2663_s27  ;;  %18 = sbr.rel (!%p16_p9) target bundleno = 3 (0x3), region = 89 }
 0x163   :  { %1815 = vsyncpa [#allocation3], 1 }
 0x164   :  { %1817 = vsyncpa [#allocation3 + $0x1], 1 }

</bundles_post_ra>
